<compile_context>
chip_gen: v7x
topology: tpu7x:2x2x1
jax: 0.10.0
libtpu: 0.0.40
codegen_flags: <defaults>
</compile_context>

<pallas_src>
import math

import jax
import jax.numpy as jnp
from jax.experimental import pallas as pl
from jax.experimental.pallas import tpu as pltpu


# ---------------------------------------------------------------------------
# Helpers
# ---------------------------------------------------------------------------

def _largest_aligned_divisor(n, target, align):
    """Largest divisor of n that is <= target and a multiple of align (or None)."""
    t = min(n, target)
    t -= t % align
    while t >= align:
        if n % t == 0:
            return t
        t -= align
    return None


# ---------------------------------------------------------------------------
# Pallas kernels
# ---------------------------------------------------------------------------

def _add_kernel(a_ref, b_ref, o_ref):
    o_ref[...] = a_ref[...] + b_ref[...]


def _conv_matmul_kernel(w_ref, b_ref, p_ref, o_ref):
    # w_ref: (Cout=16, K=288)   bf16 flattened conv weight (K order: dy, dx, cin)
    # b_ref: (Cout, 1)          f32 bias
    # p_ref: (K, Mt)            bf16 im2col patch tile (built in the wrapper)
    # o_ref: (Cout, Mt)         f32 lane-dense output tile
    acc = jnp.dot(w_ref[...], p_ref[...], preferred_element_type=jnp.float32)
    o_ref[...] = acc + b_ref[...]


# ---------------------------------------------------------------------------
# Module wrapper
# ---------------------------------------------------------------------------

class LearnersFusion:
    """JAX/Pallas port of ltr.models.rts.learners_fusion.LearnersFusion."""

    _M_TILE_TARGET = 2048      # rows of the patch matrix per grid step (bf16 tile ~1.2 MB)
    _ADD_BLOCK_BYTES = 4 << 20  # per-operand block budget for the add path

    def __init__(self, fusion_type, key=None):
        self.fusion_type = fusion_type
        if self.fusion_type == 'concat':
            if key is None:
                key = jax.random.PRNGKey(42)
            kw, kb = jax.random.split(key)
            cout, cin, kh, kwd = 16, 32, 3, 3
            # PyTorch init in the module: weight ~ N(0, sqrt(2 / (kH*kW*Cout)))
            n = kh * kwd * cout
            self.w_oihw = (jax.random.normal(kw, (cout, cin, kh, kwd), jnp.float32)
                           * math.sqrt(2.0 / n))
            # Conv2d default bias init: U(-1/sqrt(fan_in), 1/sqrt(fan_in))
            bound = 1.0 / math.sqrt(cin * kh * kwd)
            self.bias = jax.random.uniform(kb, (cout,), jnp.float32, -bound, bound)
            # (Cout, K) flattened weight, K order (dy, dx, cin), bf16 for the MXU.
            self._w_ck = (jnp.transpose(self.w_oihw, (0, 2, 3, 1))
                          .reshape(cout, kh * kwd * cin).astype(jnp.bfloat16))
            self._bias_col = self.bias.reshape(cout, 1)          # (16, 1) f32
        elif self.fusion_type != 'add':
            raise AssertionError('Type of fusion not recognized')
        # Jit the whole forward so the layout plumbing (pad / slice / transpose /
        # final reshape) fuses around the pallas_call instead of standing alone.
        self._forward = jax.jit(self._forward_impl)

    def __call__(self, seg_learner_out, clf_learner_out):
        assert seg_learner_out.shape == clf_learner_out.shape
        assert seg_learner_out.shape[0] == 1
        return self._forward(seg_learner_out, clf_learner_out)

    def _forward_impl(self, seg, clf):
        if self.fusion_type == 'add':
            return self._add(seg, clf)
        return self._concat(seg, clf)

    # -- 'add' path: lane-dense flattened view, size-driven row tiling --------
    def _add(self, seg, clf):
        shape = seg.shape
        total = math.prod(shape)

        # Pick a 128-aligned lane extent that divides the flattened size.
        cols = None
        for c in (2048, 1024, 512, 256, 128):
            if total % c == 0:
                cols = c
                break
        if cols is None:
            # No 128-multiple factorization: single whole-array block (rare corner).
            a2, b2 = seg.reshape(1, total), clf.reshape(1, total)
            out2 = pl.pallas_call(
                _add_kernel,
                out_shape=jax.ShapeDtypeStruct((1, total), seg.dtype),
            )(a2, b2)
            return out2.reshape(shape)

        rows = total // cols
        itemsize = jnp.dtype(seg.dtype).itemsize
        target_rows = max(8, self._ADD_BLOCK_BYTES // (cols * itemsize))
        if rows <= target_rows:
            br = rows
        else:
            br = _largest_aligned_divisor(rows, target_rows, 8) or rows

        a2 = seg.reshape(rows, cols)
        b2 = clf.reshape(rows, cols)
        out2 = pl.pallas_call(
            _add_kernel,
            out_shape=jax.ShapeDtypeStruct((rows, cols), seg.dtype),
            grid=(rows // br,),
            in_specs=[pl.BlockSpec((br, cols), lambda i: (i, 0))] * 2,
            out_specs=pl.BlockSpec((br, cols), lambda i: (i, 0)),
            compiler_params=pltpu.CompilerParams(
                dimension_semantics=("parallel",),
                vmem_limit_bytes=32 * 1024 * 1024),
        )(a2, b2)
        return out2.reshape(shape)

    # -- 'concat' path: wrapper-side im2col, lane-dense MXU matmul ------------
    def _concat(self, seg, clf):
        _, n, c, h, w = seg.shape
        assert 2 * c == 32, "concat channels must match conv in_channels (32)"
        cout = 16
        k = 9 * 2 * c            # 288
        m = n * h * w            # rows of the patch matrix / output lanes

        # Wrapper-side (jit-fused) concat + pad + im2col, directly in bf16 and in the
        # (K, M) orientation so the kernel output is lane-dense.
        x = jnp.concatenate([seg[0], clf[0]], axis=1)                      # (N, 32, H, W)
        xp = jnp.pad(x, ((0, 0), (0, 0), (1, 1), (1, 1))).astype(jnp.bfloat16)
        taps = [xp[:, :, dy:dy + h, dx:dx + w]
                for dy in range(3) for dx in range(3)]                      # 9 x (N,32,H,W)
        patches = jnp.stack(taps, axis=0)                                   # (9, N, 32, H, W)
        patches = patches.transpose(0, 2, 1, 3, 4).reshape(k, m)            # (288, M) bf16

        # Tile M (batch*spatial) so large N pipelines DMAs and can use both v7x TCs.
        if m <= self._M_TILE_TARGET:
            mt = m
        else:
            mt = _largest_aligned_divisor(m, self._M_TILE_TARGET, 128) or m
        grid = (m // mt,)

        cost = pl.CostEstimate(
            flops=2 * cout * k * m,
            transcendentals=0,
            bytes_accessed=(k * m * 2 + cout * k * 2 + cout * 4 + cout * m * 4))

        out_cm = pl.pallas_call(
            _conv_matmul_kernel,
            out_shape=jax.ShapeDtypeStruct((cout, m), jnp.float32),
            grid=grid,
            in_specs=[
                pl.BlockSpec((cout, k), lambda i: (0, 0)),   # weight: grid-invariant
                pl.BlockSpec((cout, 1), lambda i: (0, 0)),   # bias:   grid-invariant
                pl.BlockSpec((k, mt), lambda i: (0, i)),     # patches: M-tiled
            ],
            out_specs=pl.BlockSpec((cout, mt), lambda i: (0, i)),
            compiler_params=pltpu.CompilerParams(
                dimension_semantics=("parallel",),
                vmem_limit_bytes=32 * 1024 * 1024),
            cost_estimate=cost,
        )(self._w_ck, self._bias_col, patches)

        # (Cout, M=N*H*W) -> (N, Cout, H, W) -> [1, N, Cout, H, W], fused in the jit.
        out = out_cm.reshape(cout, n, h, w).transpose(1, 0, 2, 3)
        return out[None].astype(seg.dtype)


# ---------------------------------------------------------------------------
# Main
# ---------------------------------------------------------------------------

if __name__ == "__main__":
    key = jax.random.PRNGKey(0)
    k_seg, k_clf, k_params = jax.random.split(key, 3)

    # [1, N, C, H, W] with C = 16 so that concat along dim=2 gives 32 channels.
    shape = (1, 2, 16, 16, 16)
    seg = jax.random.normal(k_seg, shape, jnp.float32)
    clf = jax.random.normal(k_clf, shape, jnp.float32)

    # --- 'add' fusion -------------------------------------------------------
    fusion_add = LearnersFusion('add')
    out_add = jax.block_until_ready(fusion_add(seg, clf))
    assert out_add.shape == shape
    assert jnp.allclose(out_add, seg + clf, atol=1e-6), "'add' fusion mismatch"

    # --- 'concat' fusion ----------------------------------------------------
    fusion_cat = LearnersFusion('concat', key=k_params)
    out_cat = jax.block_until_ready(fusion_cat(seg, clf))
    assert out_cat.shape == (1, 2, 16, 16, 16)

    # Reference: XLA conv fed the same bf16 operands (precision-matched to the MXU
    # path) with f32 accumulation.  Vs. the original f32 PyTorch Conv2d this implies
    # a ~1e-2 relative bf16 operand tolerance (documented design choice).
    x_nchw = jnp.concatenate([seg, clf], axis=2)[0].astype(jnp.bfloat16)
    w_bf16 = fusion_cat.w_oihw.astype(jnp.bfloat16)
    ref = jax.lax.conv_general_dilated(
        x_nchw, w_bf16, window_strides=(1, 1), padding=((1, 1), (1, 1)),
        dimension_numbers=('NCHW', 'OIHW', 'NCHW'),
        preferred_element_type=jnp.float32)
    ref = ref + fusion_cat.bias.reshape(1, -1, 1, 1)
    ref = ref[None]
    assert jnp.allclose(out_cat, ref, atol=5e-3, rtol=5e-3), "'concat' fusion mismatch"

    print("KERNEL_OK")
</pallas_src>

<mosaic_0001>
module attributes {stable_mosaic.version = 11 : i64} {
  func.func @_add_kernel(%arg0: i32, %arg1: memref<4x2048xf32, #tpu.memory_space<vmem>>, %arg2: memref<4x2048xf32, #tpu.memory_space<vmem>>, %arg3: memref<4x2048xf32, #tpu.memory_space<vmem>>) attributes {dimension_semantics = [#tpu.dimension_semantics<parallel>], iteration_bounds = array<i64: 1>, scalar_prefetch = 0 : i64, scratch_operands = 0 : i64, tpu.core_type = #tpu.core_type<tc>, window_params = [{transform_indices = @transform_0, window_bounds = array<i64: 4, 2048>}, {transform_indices = @transform_1, window_bounds = array<i64: 4, 2048>}, {transform_indices = @transform_2, window_bounds = array<i64: 4, 2048>}]} {
    %c0 = arith.constant 0 : index
    %c0_0 = arith.constant 0 : index
    %0 = vector.load %arg1[%c0, %c0_0] : memref<4x2048xf32, #tpu.memory_space<vmem>>, vector<4x2048xf32>
    %c0_1 = arith.constant 0 : index
    %c0_2 = arith.constant 0 : index
    %1 = vector.load %arg2[%c0_1, %c0_2] : memref<4x2048xf32, #tpu.memory_space<vmem>>, vector<4x2048xf32>
    %2 = arith.addf %0, %1 : vector<4x2048xf32>
    %c0_3 = arith.constant 0 : index
    %c0_4 = arith.constant 0 : index
    %3 = vector.load %arg3[%c0_3, %c0_4] : memref<4x2048xf32, #tpu.memory_space<vmem>>, vector<4x2048xf32>
    tpu.vector_store %arg3[%c0_3, %c0_4], %2 {strides = array<i32>} : memref<4x2048xf32, #tpu.memory_space<vmem>>, vector<4x2048xf32>,
    return
  }
  func.func @transform_0(%arg0: i32) -> (i32, i32) {
    %c0_i32 = arith.constant 0 : i32
    %c0_i32_0 = arith.constant 0 : i32
    return %arg0, %c0_i32 : i32, i32
  }
  func.func @transform_1(%arg0: i32) -> (i32, i32) {
    %c0_i32 = arith.constant 0 : i32
    %c0_i32_0 = arith.constant 0 : i32
    return %arg0, %c0_i32 : i32, i32
  }
  func.func @transform_2(%arg0: i32) -> (i32, i32) {
    %c0_i32 = arith.constant 0 : i32
    %c0_i32_0 = arith.constant 0 : i32
    return %arg0, %c0_i32 : i32, i32
  }
}

</mosaic_0001>

<bundles_post_ra>
// kernel: _forward_impl.1
= control target key start
LH: loop header
LB: loop body
LE: loop exit
PB: predicated region body
PF: predicated region fallthrough
CT: control target
= control target key end

     0   :  { %s134_s0 = inlined_call_operand.vmem [shape: f32[4,2048], index: 0, kind: input, shape index: {}]   ;;  %s135_s1 = inlined_call_operand.vmem [shape: f32[4,2048], index: 1, kind: input, shape index: {}]   ;;  %s136_s2 = inlined_call_operand.vmem [shape: f32[4,2048], index: 2, kind: output, shape index: {}]  }
   0x1   :  { %v11_v0 = vld [vmem:[%s134_s0] sm:$0xff]  ;;  %v12_v2 = vld [vmem:[%s134_s0 + $0x8] sm:$0xff]  ;;  %v13_v5 = vld [vmem:[%s134_s0 + $0x10] sm:$0xff] }
   0x2   :  { %v19_v1 = vld [vmem:[%s135_s1] sm:$0xff]  ;;  %v20_v4 = vld [vmem:[%s135_s1 + $0x8] sm:$0xff]  ;;  %v21_v6 = vld [vmem:[%s135_s1 + $0x10] sm:$0xff] }
   0x3   :  { %v27_v3 = vadd.f32 %v19_v1, %v11_v0  ;;  %v28_v7 = vadd.f32 %v20_v4, %v12_v2  ;;  %v29_v8 = vadd.f32 %v21_v6, %v13_v5  ;;  %v14_v9 = vld [vmem:[%s134_s0 + $0x18] sm:$0xff]  ;;  %v15_v11 = vld [vmem:[%s134_s0 + $0x20] sm:$0xff]  ;;  %v16_v14 = vld [vmem:[%s134_s0 + $0x28] sm:$0xff] }
   0x4   :  { %v22_v10 = vld [vmem:[%s135_s1 + $0x18] sm:$0xff]  ;;  %v23_v13 = vld [vmem:[%s135_s1 + $0x20] sm:$0xff]  ;;  %v24_v15 = vld [vmem:[%s135_s1 + $0x28] sm:$0xff] }
   0x5   :  { %35 = vst [vmem:[%s136_s2] sm:$0xff] %v27_v3  ;;  %v30_v12 = vadd.f32 %v22_v10, %v14_v9  ;;  %36 = vst [vmem:[%s136_s2 + $0x8] sm:$0xff] %v28_v7  ;;  %v31_v16 = vadd.f32 %v23_v13, %v15_v11  ;;  %v32_v17 = vadd.f32 %v24_v15, %v16_v14  ;;  %v17_v18 = vld [vmem:[%s134_s0 + $0x30] sm:$0xff]  ;;  %v18_v20 = vld [vmem:[%s134_s0 + $0x38] sm:$0xff] }
   0x6   :  { %37 = vst [vmem:[%s136_s2 + $0x10] sm:$0xff] %v29_v8  ;;  %v25_v19 = vld [vmem:[%s135_s1 + $0x30] sm:$0xff]  ;;  %v26_v22 = vld [vmem:[%s135_s1 + $0x38] sm:$0xff] }
   0x7   :  { %38 = vst [vmem:[%s136_s2 + $0x18] sm:$0xff] %v30_v12  ;;  %v33_v21 = vadd.f32 %v25_v19, %v17_v18  ;;  %39 = vst [vmem:[%s136_s2 + $0x20] sm:$0xff] %v31_v16  ;;  %v34_v23 = vadd.f32 %v26_v22, %v18_v20 }
   0x8   :  { %40 = vst [vmem:[%s136_s2 + $0x28] sm:$0xff] %v32_v17 }
   0x9   :  { %41 = vst [vmem:[%s136_s2 + $0x30] sm:$0xff] %v33_v21  ;;  %42 = vst [vmem:[%s136_s2 + $0x38] sm:$0xff] %v34_v23 }

</bundles_post_ra>
